<compile_context>
chip_gen: v7x
topology: tpu7x:2x2x1
jax: 0.10.0
libtpu: 0.0.40
codegen_flags: <defaults>
</compile_context>

<pallas_src>
import jax
import jax.numpy as jnp
from jax import lax
from jax.experimental import pallas as pl
from jax.experimental.pallas import tpu as pltpu


def _round_up(n, m):
    return ((n + m - 1) // m) * m


def textcnn_kernel(x_ref, wim_ref, mask_ref, bconv_ref,
                   wfc_ref, bfc_ref, wout_ref, bout_ref, o_ref):
    B, S, E = x_ref.shape                      # S is the (sublane-aligned) padded length
    Tp = wim_ref.shape[-1]                     # lane-padded 3*Fc

    # --- im2col LHS: lanes [dt*E:(dt+1)*E] of row (b, l) hold x[b, l+dt, :] -----------------
    # Shifts are circular sublane rolls (XLU slot).  Wrapped rows only occur at positions
    # l >= S_true - k + 1 for every tap a branch actually uses, and exactly those rows are
    # dropped by the mask before the max-pool, so wrap-around never contaminates the result.
    xf = x_ref[...].astype(jnp.float32).reshape(B * S, E)
    cols = [xf]
    for dt in range(1, 5):                     # static unroll, taps dt = 1..4
        cols.append(pltpu.roll(xf, B * S - dt, 0))
    lhs = jnp.concatenate(cols, axis=-1).astype(jnp.bfloat16)           # (B*S, 5E)

    # --- all three conv branches (k = 3/4/5) in ONE MXU matmul, K = 5E -----------------------
    y = jnp.dot(lhs, wim_ref[...], preferred_element_type=jnp.float32)  # (B*S, Tp) f32
    y = y.reshape(B, S, Tp)

    # --- masked max-pool over valid positions, then bias + ReLU ------------------------------
    # Exact w.r.t. the PyTorch order: a per-filter constant commutes with max, ReLU is monotone.
    y = jnp.where(mask_ref[...] > 0.5, y, jnp.float32(-3e38))
    feat = jnp.maximum(jnp.max(y, axis=1) + bconv_ref[...], 0.0)        # (B, Tp) f32

    # --- MLP head (H / O lane-padded; padded feat lanes hit zero weight rows) ----------------
    h = jnp.dot(feat.astype(wfc_ref.dtype), wfc_ref[...],
                preferred_element_type=jnp.float32) + bfc_ref[...]
    h = jnp.maximum(h, 0.0)

    # TODO(synk): nn.Dropout(0.3) + F.dropout(p=0.5) treated as identity (inference semantics).
    o_ref[...] = (jnp.dot(h.astype(wout_ref.dtype), wout_ref[...],
                          preferred_element_type=jnp.float32)
                  + bout_ref[...]).astype(o_ref.dtype)                  # (B, O_padded)


def textcnn_forward(x_bse, kp, out_len, *, b_tile=512,
                    vmem_limit_bytes=56 * 1024 * 1024,
                    vmem_budget_bytes=40 * 1024 * 1024):
    """x_bse: (B, S, E) float; kp: make_kernel_params output; returns (B, out_len) float32."""
    B, S, E = x_bse.shape
    assert S == kp['S'] and E == kp['E'], (S, E, kp['S'], kp['E'])
    Sp = kp['Sp']
    Tp = kp['w_im'].shape[-1]
    OP = kp['wout'].shape[-1]

    weights = (kp['w_im'], kp['mask'], kp['bconv'],
               kp['wfc'], kp['bfc'], kp['wout'], kp['bout'])
    w_bytes = sum(int(w.size) * w.dtype.itemsize for w in weights)

    def step_bytes(bt):
        # double-buffered x tile + f32 rolled copies + bf16 im2col LHS + f32 conv result
        # + double-buffered output tile  (v7x has 64 MiB VMEM per TensorCore).
        return (2 * bt * Sp * E * 2 + 5 * bt * Sp * E * 4 + bt * Sp * 5 * E * 2
                + bt * Sp * Tp * 4 + 2 * bt * OP * 4)

    bt = min(b_tile, _round_up(B, 8))
    if B > 8:                                  # >= 2 grid steps so both v7x TCs get work
        bt = min(bt, _round_up((B + 1) // 2, 8))
    while bt > 8 and w_bytes + step_bytes(bt) > vmem_budget_bytes:
        bt -= 8
    bt = max(bt, 8)
    n_blk = -(-B // bt)
    Bp = n_blk * bt

    x_bse = x_bse.astype(jnp.bfloat16)         # bf16 MXU operands; f32 accumulation in-kernel
    if Bp != B or Sp != S:
        x_bse = jnp.pad(x_bse, ((0, Bp - B), (0, Sp - S), (0, 0)))

    in_specs = [pl.BlockSpec((bt, Sp, E), lambda i: (i, 0, 0))]
    # Constant index_maps -> weights/biases/mask stay resident in VMEM across grid steps.
    in_specs += [pl.BlockSpec(w.shape, lambda i, _n=w.ndim: (0,) * _n) for w in weights]

    out = pl.pallas_call(
        textcnn_kernel,
        out_shape=jax.ShapeDtypeStruct((Bp, OP), jnp.float32),
        grid=(n_blk,),
        in_specs=in_specs,
        out_specs=pl.BlockSpec((bt, OP), lambda i: (i, 0)),
        compiler_params=pltpu.CompilerParams(
            dimension_semantics=("parallel",),       # shard batch tiles across v7x's 2 TCs
            vmem_limit_bytes=vmem_limit_bytes),
    )(x_bse, *weights)
    return out[:B, :out_len]


# ---------- parameter re-layout (PyTorch layout -> kernel layout) ----------
def make_kernel_params(tp, sentence_max_size, emb_dim):
    Fc = tp['b3'].shape[0]
    H = tp['bfc'].shape[0]
    O = tp['bout'].shape[0]
    E, S = emb_dim, sentence_max_size
    Sp = _round_up(max(S, 8), 16)              # bf16 sublane pack -> free (B,S,E)->(B*S,E) flatten
    Tp = _round_up(3 * Fc, 128)                # lane-dense conv output
    Hp, OP = _round_up(H, 128), _round_up(O, 128)

    # im2col weight: rows [dt*E:(dt+1)*E] x cols [k_idx*Fc:(k_idx+1)*Fc] hold w_k[:, 0, dt, :].T;
    # zero rows for taps a branch doesn't use, zero columns beyond 3*Fc (padding).
    w_im = jnp.zeros((5 * E, Tp), jnp.float32)
    for k_idx, (k, w) in enumerate(((3, tp['w3']), (4, tp['w4']), (5, tp['w5']))):
        for dt in range(k):
            w_im = w_im.at[dt * E:(dt + 1) * E, k_idx * Fc:(k_idx + 1) * Fc].set(
                jnp.transpose(w[:, 0, dt, :], (1, 0)))

    bconv = jnp.zeros((1, Tp), jnp.float32)
    bconv = bconv.at[0, 0 * Fc:1 * Fc].set(tp['b3'])
    bconv = bconv.at[0, 1 * Fc:2 * Fc].set(tp['b4'])
    bconv = bconv.at[0, 2 * Fc:3 * Fc].set(tp['b5'])

    # Validity mask: branch k keeps positions l < S - k + 1 (TRUE S, so Sp padding / roll
    # wrap-around never enters the max-pool).  Padded lanes stay "valid": their values are 0.
    pos = jnp.arange(Sp)[:, None]
    mask = jnp.ones((Sp, Tp), jnp.float32)
    for k_idx, k in enumerate((3, 4, 5)):
        col = (pos < (S - k + 1)).astype(jnp.float32)
        mask = mask.at[:, k_idx * Fc:(k_idx + 1) * Fc].set(jnp.broadcast_to(col, (Sp, Fc)))
    mask = mask.reshape(1, Sp, Tp)

    # Head weights, zero-padded to 128 lanes (padded rows/cols are exactly 0 -> no contamination).
    wfc = jnp.zeros((Tp, Hp), jnp.float32).at[:3 * Fc, :H].set(tp['wfc'].T)
    bfc = jnp.zeros((1, Hp), jnp.float32).at[:, :H].set(tp['bfc'])
    wout = jnp.zeros((Hp, OP), jnp.float32).at[:H, :O].set(tp['wout'].T)
    bout = jnp.zeros((1, OP), jnp.float32).at[:, :O].set(tp['bout'])

    return {
        'w_im': w_im.astype(jnp.bfloat16), 'mask': mask, 'bconv': bconv,
        'wfc': wfc.astype(jnp.bfloat16), 'bfc': bfc,
        'wout': wout.astype(jnp.bfloat16), 'bout': bout,
        'S': S, 'Sp': Sp, 'E': E,
    }


# ---------- plain-JAX reference (PyTorch semantics, NCHW) for validation ----------
def ref_forward(x_nchw, tp, quant=lambda a: a):
    q = quant
    def branch(w, b):
        y = lax.conv_general_dilated(q(x_nchw), q(w), (1, 1), 'VALID',
                                     dimension_numbers=('NCHW', 'OIHW', 'NCHW'))
        y = jax.nn.relu(y + b[None, :, None, None])
        return jnp.max(y, axis=(2, 3))                 # MaxPool2d over the full valid extent
    p3 = branch(tp['w3'], tp['b3'])
    p4 = branch(tp['w4'], tp['b4'])
    p5 = branch(tp['w5'], tp['b5'])
    feat = jnp.concatenate([p3, p4, p5], axis=-1)
    h = jax.nn.relu(q(feat) @ q(tp['wfc'].T) + tp['bfc'])
    return q(h) @ q(tp['wout'].T) + tp['bout']


def xavier_uniform(key, shape, fan_in, fan_out):
    a = jnp.sqrt(6.0 / (fan_in + fan_out))
    return jax.random.uniform(key, shape, jnp.float32, -a, a)


def uniform_bias(key, shape, fan_in):
    a = 1.0 / jnp.sqrt(float(fan_in))
    return jax.random.uniform(key, shape, jnp.float32, -a, a)


if __name__ == "__main__":
    # output_len, word_embedding_dimension, sentence_max_size, hidden_units, textcnn_filter_count
    O, E, S, H, Fc = 4, 32, 16, 32, 8
    B = 2

    key = jax.random.PRNGKey(0)
    ks = jax.random.split(key, 12)

    x_nchw = jax.random.normal(ks[0], (B, 1, S, E), jnp.float32)

    # PyTorch-layout parameters (deterministic synthetic init)
    tp = {
        'w3': xavier_uniform(ks[1], (Fc, 1, 3, E), 1 * 3 * E, Fc * 3 * E),
        'b3': uniform_bias(ks[2], (Fc,), 3 * E),
        'w4': xavier_uniform(ks[3], (Fc, 1, 4, E), 1 * 4 * E, Fc * 4 * E),
        'b4': uniform_bias(ks[4], (Fc,), 4 * E),
        'w5': xavier_uniform(ks[5], (Fc, 1, 5, E), 1 * 5 * E, Fc * 5 * E),
        'b5': uniform_bias(ks[6], (Fc,), 5 * E),
        'wfc': xavier_uniform(ks[7], (H, 3 * Fc), 3 * Fc, H),
        'bfc': uniform_bias(ks[8], (H,), 3 * Fc),
        'wout': xavier_uniform(ks[9], (O, H), H, O),
        'bout': uniform_bias(ks[10], (O,), H),
    }

    kp = make_kernel_params(tp, S, E)
    x_bse = x_nchw[:, 0]                                  # (B, S, E)

    out = jax.block_until_ready(textcnn_forward(x_bse, kp, O))

    bf16_rt = lambda a: a.astype(jnp.bfloat16).astype(jnp.float32)
    ref_q = jax.block_until_ready(ref_forward(x_nchw, tp, quant=bf16_rt))   # same bf16 operand rounding
    ref_f = jax.block_until_ready(ref_forward(x_nchw, tp))                  # exact f32 PyTorch semantics

    assert out.shape == (B, O), out.shape
    # Tight check vs reference with identical bf16 operand rounding (f32 accumulation everywhere).
    assert jnp.allclose(out, ref_q, rtol=1e-2, atol=1e-2), (out, ref_q)
    # Loose check vs the exact f32 reference (bf16 MXU operands introduce ~1% drift).
    assert jnp.allclose(out, ref_f, rtol=1e-1, atol=1e-1), (out, ref_f)
    print("KERNEL_OK")
</pallas_src>

<mosaic_0001>
module attributes {stable_mosaic.version = 11 : i64} {
  func.func @textcnn_kernel(%arg0: i32, %arg1: memref<8x16x32xbf16, #tpu.memory_space<vmem>>, %arg2: memref<160x128xbf16, #tpu.memory_space<vmem>>, %arg3: memref<1x16x128xf32, #tpu.memory_space<vmem>>, %arg4: memref<1x128xf32, #tpu.memory_space<vmem>>, %arg5: memref<128x128xbf16, #tpu.memory_space<vmem>>, %arg6: memref<1x128xf32, #tpu.memory_space<vmem>>, %arg7: memref<128x128xbf16, #tpu.memory_space<vmem>>, %arg8: memref<1x128xf32, #tpu.memory_space<vmem>>, %arg9: memref<8x128xf32, #tpu.memory_space<vmem>>) attributes {dimension_semantics = [#tpu.dimension_semantics<parallel>], iteration_bounds = array<i64: 1>, scalar_prefetch = 0 : i64, scratch_operands = 0 : i64, tpu.core_type = #tpu.core_type<tc>, window_params = [{transform_indices = @transform_0, window_bounds = array<i64: 8, 16, 32>}, {pipeline_mode = #tpu.pipeline_mode<synchronous>, transform_indices = @transform_1, window_bounds = array<i64: 160, 128>}, {pipeline_mode = #tpu.pipeline_mode<synchronous>, transform_indices = @transform_2, window_bounds = array<i64: 1, 16, 128>}, {pipeline_mode = #tpu.pipeline_mode<synchronous>, transform_indices = @transform_3, window_bounds = array<i64: 1, 128>}, {pipeline_mode = #tpu.pipeline_mode<synchronous>, transform_indices = @transform_4, window_bounds = array<i64: 128, 128>}, {pipeline_mode = #tpu.pipeline_mode<synchronous>, transform_indices = @transform_5, window_bounds = array<i64: 1, 128>}, {pipeline_mode = #tpu.pipeline_mode<synchronous>, transform_indices = @transform_6, window_bounds = array<i64: 128, 128>}, {pipeline_mode = #tpu.pipeline_mode<synchronous>, transform_indices = @transform_7, window_bounds = array<i64: 1, 128>}, {transform_indices = @transform_8, window_bounds = array<i64: 8, 128>}]} {
    %c0 = arith.constant 0 : index
    %c0_0 = arith.constant 0 : index
    %c0_1 = arith.constant 0 : index
    %0 = vector.load %arg1[%c0, %c0_0, %c0_1] : memref<8x16x32xbf16, #tpu.memory_space<vmem>>, vector<8x16x32xbf16>
    %1 = arith.extf %0 : vector<8x16x32xbf16> to vector<8x16x32xf32>
    %2 = vector.shape_cast %1 : vector<8x16x32xf32> to vector<128x32xf32>
    %c127_i32 = arith.constant 127 : i32
    %3 = tpu.dynamic_rotate %2 by %c127_i32 dim 0 : vector<128x32xf32>, i32 -> vector<128x32xf32>
    %c126_i32 = arith.constant 126 : i32
    %4 = tpu.dynamic_rotate %2 by %c126_i32 dim 0 : vector<128x32xf32>, i32 -> vector<128x32xf32>
    %c125_i32 = arith.constant 125 : i32
    %5 = tpu.dynamic_rotate %2 by %c125_i32 dim 0 : vector<128x32xf32>, i32 -> vector<128x32xf32>
    %c124_i32 = arith.constant 124 : i32
    %6 = tpu.dynamic_rotate %2 by %c124_i32 dim 0 : vector<128x32xf32>, i32 -> vector<128x32xf32>
    %7 = tpu.concatenate %2, %3, %4, %5, %6 in 1 : vector<128x32xf32>, vector<128x32xf32>, vector<128x32xf32>, vector<128x32xf32>, vector<128x32xf32> -> vector<128x160xf32>
    %8 = arith.truncf %7 : vector<128x160xf32> to vector<128x160xbf16>
    %c0_2 = arith.constant 0 : index
    %c0_3 = arith.constant 0 : index
    %9 = vector.load %arg2[%c0_2, %c0_3] : memref<160x128xbf16, #tpu.memory_space<vmem>>, vector<160x128xbf16>
    %cst = arith.constant dense<0.000000e+00> : vector<128x128xf32>
    %10 = tpu.matmul %8, %9, %cst {dimension_numbers = #tpu.dot_dimension_numbers<[1], [0], [0], [1], [0, 0, 1, 1], [], []>} : vector<128x160xbf16>, vector<160x128xbf16>, vector<128x128xf32> -> vector<128x128xf32>
    %11 = vector.shape_cast %10 : vector<128x128xf32> to vector<8x16x128xf32>
    %c0_4 = arith.constant 0 : index
    %c0_5 = arith.constant 0 : index
    %c0_6 = arith.constant 0 : index
    %12 = vector.load %arg3[%c0_4, %c0_5, %c0_6] : memref<1x16x128xf32, #tpu.memory_space<vmem>>, vector<1x16x128xf32>
    %cst_7 = arith.constant 5.000000e-01 : f32
    %13 = vector.broadcast %cst_7 : f32 to vector<1x16x128xf32>
    %14 = arith.cmpf ogt, %12, %13 : vector<1x16x128xf32>
    %cst_8 = arith.constant -3.000000e+38 : f32
    %15 = vector.shape_cast %14 : vector<1x16x128xi1> to vector<1x16x128xi1>
    %16 = vector.broadcast %15 : vector<1x16x128xi1> to vector<8x16x128xi1>
    %17 = vector.broadcast %cst_8 : f32 to vector<8x16x128xf32>
    %18 = arith.select %16, %11, %17 : vector<8x16x128xi1>, vector<8x16x128xf32>
    %cst_9 = arith.constant dense<0xFF800000> : vector<8x128xf32>
    %19 = vector.multi_reduction <maximumf>, %18, %cst_9 [1] : vector<8x16x128xf32> to vector<8x128xf32>
    %c0_10 = arith.constant 0 : index
    %c0_11 = arith.constant 0 : index
    %20 = vector.load %arg4[%c0_10, %c0_11] : memref<1x128xf32, #tpu.memory_space<vmem>>, vector<1x128xf32>
    %21 = vector.broadcast %20 : vector<1x128xf32> to vector<8x128xf32>
    %22 = arith.addf %19, %21 : vector<8x128xf32>
    %cst_12 = arith.constant 0.000000e+00 : f32
    %23 = vector.broadcast %cst_12 : f32 to vector<8x128xf32>
    %24 = arith.maximumf %22, %23 : vector<8x128xf32>
    %25 = arith.truncf %24 : vector<8x128xf32> to vector<8x128xbf16>
    %c0_13 = arith.constant 0 : index
    %c0_14 = arith.constant 0 : index
    %26 = vector.load %arg5[%c0_13, %c0_14] : memref<128x128xbf16, #tpu.memory_space<vmem>>, vector<128x128xbf16>
    %cst_15 = arith.constant dense<0.000000e+00> : vector<8x128xf32>
    %27 = tpu.matmul %25, %26, %cst_15 {dimension_numbers = #tpu.dot_dimension_numbers<[1], [0], [0], [1], [0, 0, 1, 1], [], []>} : vector<8x128xbf16>, vector<128x128xbf16>, vector<8x128xf32> -> vector<8x128xf32>
    %c0_16 = arith.constant 0 : index
    %c0_17 = arith.constant 0 : index
    %28 = vector.load %arg6[%c0_16, %c0_17] : memref<1x128xf32, #tpu.memory_space<vmem>>, vector<1x128xf32>
    %29 = vector.broadcast %28 : vector<1x128xf32> to vector<8x128xf32>
    %30 = arith.addf %27, %29 : vector<8x128xf32>
    %cst_18 = arith.constant 0.000000e+00 : f32
    %31 = vector.broadcast %cst_18 : f32 to vector<8x128xf32>
    %32 = arith.maximumf %30, %31 : vector<8x128xf32>
    %33 = arith.truncf %32 : vector<8x128xf32> to vector<8x128xbf16>
    %c0_19 = arith.constant 0 : index
    %c0_20 = arith.constant 0 : index
    %34 = vector.load %arg7[%c0_19, %c0_20] : memref<128x128xbf16, #tpu.memory_space<vmem>>, vector<128x128xbf16>
    %cst_21 = arith.constant dense<0.000000e+00> : vector<8x128xf32>
    %35 = tpu.matmul %33, %34, %cst_21 {dimension_numbers = #tpu.dot_dimension_numbers<[1], [0], [0], [1], [0, 0, 1, 1], [], []>} : vector<8x128xbf16>, vector<128x128xbf16>, vector<8x128xf32> -> vector<8x128xf32>
    %c0_22 = arith.constant 0 : index
    %c0_23 = arith.constant 0 : index
    %36 = vector.load %arg8[%c0_22, %c0_23] : memref<1x128xf32, #tpu.memory_space<vmem>>, vector<1x128xf32>
    %37 = vector.broadcast %36 : vector<1x128xf32> to vector<8x128xf32>
    %38 = arith.addf %35, %37 : vector<8x128xf32>
    %c0_24 = arith.constant 0 : index
    %c0_25 = arith.constant 0 : index
    %39 = vector.load %arg9[%c0_24, %c0_25] : memref<8x128xf32, #tpu.memory_space<vmem>>, vector<8x128xf32>
    tpu.vector_store %arg9[%c0_24, %c0_25], %38 {strides = array<i32>} : memref<8x128xf32, #tpu.memory_space<vmem>>, vector<8x128xf32>,
    return
  }
  func.func @transform_0(%arg0: i32) -> (i32, i32, i32) {
    %c0_i32 = arith.constant 0 : i32
    %c0_i32_0 = arith.constant 0 : i32
    %c0_i32_1 = arith.constant 0 : i32
    return %arg0, %c0_i32, %c0_i32_0 : i32, i32, i32
  }
  func.func @transform_1(%arg0: i32) -> (i32, i32) {
    %c0_i32 = arith.constant 0 : i32
    %c0_i32_0 = arith.constant 0 : i32
    %c0_i32_1 = arith.constant 0 : i32
    return %c0_i32, %c0_i32_0 : i32, i32
  }
  func.func @transform_2(%arg0: i32) -> (i32, i32, i32) {
    %c0_i32 = arith.constant 0 : i32
    %c0_i32_0 = arith.constant 0 : i32
    %c0_i32_1 = arith.constant 0 : i32
    %c0_i32_2 = arith.constant 0 : i32
    return %c0_i32, %c0_i32_0, %c0_i32_1 : i32, i32, i32
  }
  func.func @transform_3(%arg0: i32) -> (i32, i32) {
    %c0_i32 = arith.constant 0 : i32
    %c0_i32_0 = arith.constant 0 : i32
    %c0_i32_1 = arith.constant 0 : i32
    return %c0_i32, %c0_i32_0 : i32, i32
  }
  func.func @transform_4(%arg0: i32) -> (i32, i32) {
    %c0_i32 = arith.constant 0 : i32
    %c0_i32_0 = arith.constant 0 : i32
    %c0_i32_1 = arith.constant 0 : i32
    return %c0_i32, %c0_i32_0 : i32, i32
  }
  func.func @transform_5(%arg0: i32) -> (i32, i32) {
    %c0_i32 = arith.constant 0 : i32
    %c0_i32_0 = arith.constant 0 : i32
    %c0_i32_1 = arith.constant 0 : i32
    return %c0_i32, %c0_i32_0 : i32, i32
  }
  func.func @transform_6(%arg0: i32) -> (i32, i32) {
    %c0_i32 = arith.constant 0 : i32
    %c0_i32_0 = arith.constant 0 : i32
    %c0_i32_1 = arith.constant 0 : i32
    return %c0_i32, %c0_i32_0 : i32, i32
  }
  func.func @transform_7(%arg0: i32) -> (i32, i32) {
    %c0_i32 = arith.constant 0 : i32
    %c0_i32_0 = arith.constant 0 : i32
    %c0_i32_1 = arith.constant 0 : i32
    return %c0_i32, %c0_i32_0 : i32, i32
  }
  func.func @transform_8(%arg0: i32) -> (i32, i32) {
    %c0_i32 = arith.constant 0 : i32
    %c0_i32_0 = arith.constant 0 : i32
    return %arg0, %c0_i32 : i32, i32
  }
}

</mosaic_0001>

<bundles_post_ra>
// kernel: tpu_custom_call.1
= control target key start
LH: loop header
LB: loop body
LE: loop exit
PB: predicated region body
PF: predicated region fallthrough
CT: control target
= control target key end

     0   :  { %13 = vsyncpa [#allocation3], 0  ;;  %s2165_s0 = inlined_call_operand.hbm [shape: bf16[8,16,32], index: 0, kind: input, shape index: {}]   ;;  %s2166_s1 = inlined_call_operand.hbm [shape: bf16[160,128], index: 1, kind: input, shape index: {}]   ;;  %s2167_s2 = inlined_call_operand.hbm [shape: f32[1,16,128], index: 2, kind: input, shape index: {}]   ;;  %s2168_s3 = inlined_call_operand.vmem [shape: f32[1,128], index: 3, kind: input, shape index: {}]   ;;  %s2169_s4 = inlined_call_operand.hbm [shape: bf16[128,128], index: 4, kind: input, shape index: {}]   ;;  %s2170_s5 = inlined_call_operand.vmem [shape: f32[1,128], index: 5, kind: input, shape index: {}]   ;;  %s2171_s6 = inlined_call_operand.hbm [shape: bf16[128,128], index: 6, kind: input, shape index: {}]   ;;  %s2172_s7 = inlined_call_operand.vmem [shape: f32[1,128], index: 7, kind: input, shape index: {}]   ;;  %s2173_s8 = inlined_call_operand.hbm [shape: f32[8,128], index: 8, kind: output, shape index: {}]  }
   0x1   :  { %14 = vsyncpa [#allocation6], 0 }
   0x2   :  { %15 = vsyncpa [#allocation9], 0 }
   0x3   :  { %16 = vsyncpa [#allocation4], 0  ;;  %s1552_s27 = smov [#allocation5]   ;;  %s1553_s29 = smov [#allocation8]  }
   0x4   :  { %s34_s28 = sshll.u32 %s1552_s27, 4  ;;  %s60_s30 = sshll.u32 %s1553_s29, 4  ;;  %s35_s28 = int_to_ptr.vmem [resolvable:$true] %s34_s28  ;;  %s1612_s30 = int_to_ptr.vmem [resolvable:$true] %s60_s30 }
   0x5   :  { %s1412_s11 = scalar_lea.hbm %s2166_s1, 1280 }
   0x6   :  { %p1413_p0 = scmp.ne.s32.totalorder %s2166_s1, %s1412_s11  ;;  %p1416_p1 = scmp.lt.u32.totalorder %s1412_s11, %s2166_s1 }
   0x8   :  { %p1418_p2 = pnand %p1416_p1, %p1413_p0 }
   0xa   :  { %1421 = shalt.err (!%p1418_p2)
}
   0xb   :  { %s1422_s16 = scalar_lea.vmem %s35_s28, 1280  ;;  %p1427_p4 = scmp.lt.s32.totalorder %s35_s28, %s35_s28 }
   0xc   :  { %p1423_p3 = scmp.ne.s32.totalorder %s35_s28, %s1422_s16  ;;  %p1428_p5 = scmp.lt.s32.totalorder %s1422_s16, %s1422_s16 }
   0xe   :  { %p1429_p6 = por %p1428_p5, %p1427_p4 }
  0x10   :  { %p1430_p7 = pnand %p1429_p6, %p1423_p3 }
  0x12   :  { %1433 = shalt.err (!%p1430_p7)
}
  0x13   :  { %s1554_s17 = smov 64   ;;  %s1555_s18 = smov 4  }
  0x14   :  { %40 = dma.hbm_to_vmem [thread:$0]  %s2166_s1, 1280, %s35_s28, [#allocation6], %s1554_s17, %s1554_s17, %s1555_s18  }
  0x15   :  { %s1434_s23 = scalar_lea.hbm %s2169_s4, 1024 }
  0x16   :  { %p1435_p8 = scmp.ne.s32.totalorder %s2169_s4, %s1434_s23  ;;  %p1438_p9 = scmp.lt.u32.totalorder %s1434_s23, %s2169_s4 }
  0x18   :  { %p1440_p10 = pnand %p1438_p9, %p1435_p8 }
  0x1a   :  { %1443 = shalt.err (!%p1440_p10)
}
  0x1b   :  { %s1444_s29 = scalar_lea.vmem %s1612_s30, 1024  ;;  %p1449_p12 = scmp.lt.s32.totalorder %s1612_s30, %s1612_s30 }
  0x1c   :  { %p1445_p11 = scmp.ne.s32.totalorder %s1612_s30, %s1444_s29  ;;  %p1450_p13 = scmp.lt.s32.totalorder %s1444_s29, %s1444_s29 }
  0x1e   :  { %p1451_p0 = por %p1450_p13, %p1449_p12 }
  0x20   :  { %p1452_p1 = pnand %p1451_p0, %p1445_p11 }
  0x22   :  { %1455 = shalt.err (!%p1452_p1)
}
  0x23   :  { %66 = dma.hbm_to_vmem [thread:$0]  %s2169_s4, 1024, %s1612_s30, [#allocation9], %s1554_s17, %s1554_s17, %s1555_s18  }
  0x24   :  { %s1556_s9 = smov [#allocation2]   ;;  %s1557_s11 = smov [#allocation7]  }
  0x25   :  { %s22_s10 = sshll.u32 %s1556_s9, 4  ;;  %s46_s12 = sshll.u32 %s1557_s11, 4  ;;  %s23_s10 = int_to_ptr.vmem [resolvable:$true] %s22_s10  ;;  %s1649_s12 = int_to_ptr.vmem [resolvable:$true] %s46_s12 }
  0x26   :  { %s1456_s15 = scalar_lea.hbm %s2165_s0, 1024 }
  0x27   :  { %p1457_p2 = scmp.ne.s32.totalorder %s2165_s0, %s1456_s15  ;;  %p1460_p3 = scmp.lt.u32.totalorder %s1456_s15, %s2165_s0 }
  0x29   :  { %p1462_p4 = pnand %p1460_p3, %p1457_p2 }
  0x2b   :  { %1465 = shalt.err (!%p1462_p4)
}
  0x2c   :  { %s1466_s4 = scalar_lea.vmem %s23_s10, 1024  ;;  %p1471_p6 = scmp.lt.s32.totalorder %s23_s10, %s23_s10 }
  0x2d   :  { %p1467_p5 = scmp.ne.s32.totalorder %s23_s10, %s1466_s4  ;;  %p1472_p7 = scmp.lt.s32.totalorder %s1466_s4, %s1466_s4 }
  0x2f   :  { %p1473_p8 = por %p1472_p7, %p1471_p6 }
  0x31   :  { %p1474_p9 = pnand %p1473_p8, %p1467_p5 }
  0x33   :  { %1477 = shalt.err (!%p1474_p9)
}
  0x34   :  { %28 = dma.hbm_to_vmem [thread:$0]  %s2165_s0, 1024, %s23_s10, [#allocation3], %s1554_s17, %s1554_s17, %s1555_s18  }
  0x35   :  { %s1478_s25 = scalar_lea.hbm %s2167_s2, 256 }
  0x36   :  { %p1479_p10 = scmp.ne.s32.totalorder %s2167_s2, %s1478_s25  ;;  %p1482_p11 = scmp.lt.u32.totalorder %s1478_s25, %s2167_s2 }
  0x38   :  { %p1484_p12 = pnand %p1482_p11, %p1479_p10 }
  0x3a   :  { %1487 = shalt.err (!%p1484_p12)
}
  0x3b   :  { %s1488_s28 = scalar_lea.vmem %s1649_s12, 256  ;;  %p1493_p0 = scmp.lt.s32.totalorder %s1649_s12, %s1649_s12 }
  0x3c   :  { %p1489_p13 = scmp.ne.s32.totalorder %s1649_s12, %s1488_s28  ;;  %p1494_p1 = scmp.lt.s32.totalorder %s1488_s28, %s1488_s28 }
  0x3e   :  { %p1495_p2 = por %p1494_p1, %p1493_p0 }
  0x40   :  { %p1496_p3 = pnand %p1495_p2, %p1489_p13 }
  0x42   :  { %1499 = shalt.err (!%p1496_p3)
}
  0x43   :  { %s1558_s0 = smov 128   ;;  %s1559_s9 = smov 8  }
  0x44   :  { %52 = dma.hbm_to_vmem [thread:$0]  %s2167_s2, 256, %s1649_s12, [#allocation6], %s1558_s0, %s1558_s0, %s1559_s9  }
  0x45   :  { %s1560_s13 = smov [#allocation10]   ;;  %s1500_s19 = scalar_lea.hbm %s2171_s6, 1024 }
  0x46   :  { %s74_s14 = sshll.u32 %s1560_s13, 4  ;;  %p1501_p4 = scmp.ne.s32.totalorder %s2171_s6, %s1500_s19  ;;  %s75_s14 = int_to_ptr.vmem [resolvable:$true] %s74_s14 }
  0x47   :  { %p1504_p5 = scmp.lt.u32.totalorder %s1500_s19, %s2171_s6 }
  0x49   :  { %p1506_p6 = pnand %p1504_p5, %p1501_p4 }
  0x4b   :  { %1509 = shalt.err (!%p1506_p6)
}
  0x4c   :  { %s1510_s22 = scalar_lea.vmem %s75_s14, 1024  ;;  %p1515_p8 = scmp.lt.s32.totalorder %s75_s14, %s75_s14 }
  0x4d   :  { %p1511_p7 = scmp.ne.s32.totalorder %s75_s14, %s1510_s22  ;;  %p1516_p9 = scmp.lt.s32.totalorder %s1510_s22, %s1510_s22 }
  0x4f   :  { %p1517_p10 = por %p1516_p9, %p1515_p8 }
  0x51   :  { %p1518_p11 = pnand %p1517_p10, %p1511_p7 }
  0x53   :  { %1521 = shalt.err (!%p1518_p11)
}
  0x54   :  { %80 = dma.hbm_to_vmem [thread:$0]  %s2171_s6, 1024, %s75_s14, [#allocation9], %s1554_s17, %s1554_s17, %s1555_s18  }
  0x55   :  { %1544 = dma.done.wait [#allocation3], 1024  }
  0x56   :  { %1545 = vsyncadd [#allocation3], 4294966272 }
  0x57   :  { %1546 = dma.done.wait [#allocation6], 1536  }
  0x58   :  { %1547 = vsyncadd [#allocation6], 4294965760 }
  0x59   :  { %1548 = dma.done.wait [#allocation9], 2048  }
  0x5a   :  { %1549 = vsyncadd [#allocation9], 4294965248  ;;  %v147_v0 = vlaneseq  ;;  %v1561_v1 = vmov 0   ;;  %v1155_v3 = vld [vmem:[#allocation2] sm:$0xff]   ;;  %v1186_v4 = vld [vmem:[#allocation2 + $0x8] sm:$0xff]   ;;  %s1562_s6 = smov 32  }
  0x5b   :  { %628 = vmatprep.subr.bf16.mxu0 %v1561_v1  ;;  %v1187_v5 = vld [vmem:[#allocation2 + $0x10] sm:$0xff]   ;;  %v1704_v6 = vunpack.c.l.bf16 %v1155_v3  ;;  %v1706_v7 = vunpack.c.h.bf16 %v1155_v3  ;;  %v1708_v8 = vunpack.c.l.bf16 %v1186_v4  ;;  %v1710_v9 = vunpack.c.h.bf16 %v1186_v4  ;;  %v1188_v10 = vld [vmem:[#allocation2 + $0x18] sm:$0xff]   ;;  %v1386_v23 = vld [vmem:[#allocation5] sm:$0xff]   ;;  %s1563_s18 = smov 96   ;;  %s1566_s27 = smov [#allocation11]  }
  0x5c   :  { %v1699_v2 = vshrl.u32 %v147_v0, 7  ;;  %v1712_v11 = vunpack.c.l.bf16 %v1187_v5  ;;  %v1714_v12 = vunpack.c.h.bf16 %v1187_v5  ;;  %v1716_v13 = vunpack.c.l.bf16 %v1188_v10  ;;  %629 = vmatpush1.bf16.msra.mxu0 %v1386_v23  ;;  %v1387_v32 = vld [vmem:[#allocation5 + $0x8] sm:$0xff]   ;;  %v1189_v41 = vld [vmem:[#allocation2 + $0x20] sm:$0xff]   ;;  %v1388_v46 = vld [vmem:[#allocation5 + $0x10] sm:$0xff]   ;;  %s1106_s29 = sshll.u32 %s1566_s27, 4  ;;  %s1107_s29 = int_to_ptr.vmem [resolvable:$true] %s1106_s29 }
  0x5d   :  { %v1718_v14 = vunpack.c.h.bf16 %v1188_v10  ;;  %v131_v15 = vrot.slane %v1704_v6, 1  ;;  %v132_v16 = vrot.slane %v1706_v7, 1  ;;  %v133_v17 = vrot.slane %v1708_v8, 1  ;;  %630 = vmatprep.subr.bf16.mxu0 %v1561_v1  ;;  %v1389_v0 = vld [vmem:[#allocation5 + $0x18] sm:$0xff]   ;;  %v1190_v5 = vld [vmem:[#allocation2 + $0x28] sm:$0xff]   ;;  %p1527_p13 = scmp.lt.s32.totalorder %s1107_s29, %s1107_s29 }
  0x5e   :  { %vm149_vm0 = vcmp.lt.s32.totalorder %v1699_v2, 7  ;;  %vm215_vm1 = vcmp.lt.s32.totalorder %v1699_v2, 5  ;;  %vm182_vm2 = vcmp.lt.s32.totalorder %v1699_v2, 6  ;;  %v199_v18 = vrot.slane %v1704_v6, 3 }
  0x5f   :  { %v200_v19 = vrot.slane %v1706_v7, 3  ;;  %v201_v20 = vrot.slane %v1708_v8, 3  ;;  %v166_v21 = vrot.slane %v1704_v6, 2  ;;  %v167_v22 = vrot.slane %v1706_v7, 2 }
  0x60   :  { %v163_v24 = vsel %vm149_vm0, %v132_v16, %v133_v17  ;;  %v164_v25 = vsel %vm149_vm0, %v131_v15, %v132_v16  ;;  %v168_v26 = vrot.slane %v1708_v8, 2  ;;  %v134_v27 = vrot.slane %v1710_v9, 1  ;;  %631 = vmatpush1.bf16.msra.mxu0 %v1387_v32 }
  0x61   :  { %v1266_v28 = vpack.i.bf16 %v163_v24, %v164_v25  ;;  %v229_v29 = vsel %vm215_vm1, %v200_v19, %v201_v20  ;;  %v230_v30 = vsel %vm215_vm1, %v199_v18, %v200_v19  ;;  %v197_v31 = vsel %vm182_vm2, %v166_v21, %v167_v22  ;;  %632 = vmatprep.subr.bf16.mxu0 %v1561_v1 }
  0x62   :  { %v1276_v33 = vpack.i.bf16 %v229_v29, %v230_v30  ;;  %v196_v34 = vsel %vm182_vm2, %v167_v22, %v168_v26  ;;  %v135_v35 = vrot.slane %v1712_v11, 1  ;;  %v162_v36 = vsel %vm149_vm0, %v133_v17, %v134_v27  ;;  %v1390_v22 = vld [vmem:[#allocation5 + $0x20] sm:$0xff]  }
  0x63   :  { %1267 = vrot.lane.b32.xlu0 %v1266_v28, %s1562_s6  ;;  %v1271_v37 = vpack.i.bf16 %v196_v34, %v197_v31  ;;  %v169_v38 = vrot.slane %v1710_v9, 2  ;;  %v170_v39 = vrot.slane %v1712_v11, 2  ;;  %v202_v40 = vrot.slane %v1710_v9, 3 }
  0x64   :  { %1277 = vrot.lane.b32.xlu1 %v1276_v33, %s1563_s18  ;;  %v161_v42 = vsel %vm149_vm0, %v134_v27, %v135_v35  ;;  %v203_v43 = vrot.slane %v1712_v11, 3  ;;  %v136_v44 = vrot.slane %v1714_v12, 1  ;;  %v137_v45 = vrot.slane %v1716_v13, 1  ;;  %633 = vmatpush1.bf16.msra.mxu0 %v1388_v46 }
  0x65   :  { %v1281_v47 = vpack.i.bf16 %v161_v42, %v162_v36  ;;  %v194_v48 = vsel %vm182_vm2, %v169_v38, %v170_v39  ;;  %v195_v49 = vsel %vm182_vm2, %v168_v26, %v169_v38  ;;  %v228_v50 = vsel %vm215_vm1, %v201_v20, %v202_v40  ;;  %634 = vmatprep.subr.bf16.mxu0 %v1561_v1  ;;  %v1191_v20 = vld [vmem:[#allocation2 + $0x30] sm:$0xff]  }
  0x66   :  { %v1286_v51 = vpack.i.bf16 %v194_v48, %v195_v49  ;;  %v227_v52 = vsel %vm215_vm1, %v202_v40, %v203_v43  ;;  %v159_v53 = vsel %vm149_vm0, %v136_v44, %v137_v45  ;;  %v160_v54 = vsel %vm149_vm0, %v135_v35, %v136_v44 }
  0x67   :  { %1272 = vrot.lane.b32.xlu0 %v1271_v37, %s1554_s17  ;;  %v171_v55 = vrot.slane %v1714_v12, 2  ;;  %v172_v56 = vrot.slane %v1716_v13, 2  ;;  %v1291_v57 = vpack.i.bf16 %v227_v52, %v228_v50  ;;  %v204_v58 = vrot.slane %v1714_v12, 3  ;;  %v1192_v50 = vld [vmem:[#allocation2 + $0x38] sm:$0xff]   ;;  %v1392_v52 = vld [vmem:[#allocation5 + $0x30] sm:$0xff]  }
  0x68   :  { %1282 = vrot.lane.b32.xlu1 %v1281_v47, %s1562_s6  ;;  %v205_v59 = vrot.slane %v1716_v13, 3  ;;  %v1781_v60 = vunpack.c.l.bf16 %v1189_v41  ;;  %v138_v63 = vrot.slane %v1718_v14, 1  ;;  %v1296_v3 = vpack.i.bf16 %v159_v53, %v160_v54  ;;  %635 = vmatpush1.bf16.msra.mxu0 %v1389_v0 }
  0x69   :  { %v192_v61 = vsel %vm182_vm2, %v171_v55, %v172_v56  ;;  %v193_v62 = vsel %vm182_vm2, %v170_v39, %v171_v55  ;;  %v173_v17 = vrot.slane %v1718_v14, 2  ;;  %v206_v19 = vrot.slane %v1718_v14, 3  ;;  %636 = vmatprep.subr.bf16.mxu0 %v1561_v1  ;;  %v1391_v39 = vld [vmem:[#allocation5 + $0x28] sm:$0xff]  }
  0x6a   :  { %v139_v4 = vrot.slane %v1781_v60, 1  ;;  %v1301_v10 = vpack.i.bf16 %v192_v61, %v193_v62  ;;  %v225_v16 = vsel %vm215_vm1, %v204_v58, %v205_v59  ;;  %v226_v23 = vsel %vm215_vm1, %v203_v43, %v204_v58 }
  0x6b   :  { %1287 = vrot.lane.b32.xlu0 %v1286_v51, %s1554_s17  ;;  %v174_v24 = vrot.slane %v1781_v60, 2  ;;  %v207_v25 = vrot.slane %v1781_v60, 3  ;;  %v1800_v26 = vunpack.c.h.bf16 %v1189_v41  ;;  %v158_v28 = vsel %vm149_vm0, %v137_v45, %v138_v63 }
  0x6c   :  { %1292 = vrot.lane.b32.xlu1 %v1291_v57, %s1563_s18  ;;  %v157_v27 = vsel %vm149_vm0, %v138_v63, %v139_v4  ;;  %v1806_v29 = vunpack.c.l.bf16 %v1190_v5  ;;  %v1306_v31 = vpack.i.bf16 %v225_v16, %v226_v23  ;;  %v191_v32 = vsel %vm182_vm2, %v172_v56, %v173_v17  ;;  %637 = vmatpush1.bf16.msra.mxu0 %v1390_v22 }
  0x6d   :  { %v140_v30 = vrot.slane %v1800_v26, 1  ;;  %v1814_v34 = vunpack.c.h.bf16 %v1190_v5  ;;  %v1311_v35 = vpack.i.bf16 %v157_v27, %v158_v28  ;;  %v190_v36 = vsel %vm182_vm2, %v173_v17, %v174_v24  ;;  %638 = vmatprep.subr.bf16.mxu0 %v1561_v1 }
  0x6e   :  { %v141_v33 = vrot.slane %v1806_v29, 1  ;;  %v175_v37 = vrot.slane %v1800_v26, 2  ;;  %v1820_v38 = vunpack.c.l.bf16 %v1191_v20  ;;  %v223_v40 = vsel %vm215_vm1, %v206_v19, %v207_v25 }
  0x6f   :  { %1297 = vrot.lane.b32.xlu0 %v1296_v3, %s1562_s6  ;;  %v224_v41 = vsel %vm215_vm1, %v205_v59, %v206_v19  ;;  %v176_v42 = vrot.slane %v1806_v29, 2  ;;  %v208_v43 = vrot.slane %v1800_v26, 3  ;;  %v156_v45 = vsel %vm149_vm0, %v139_v4, %v140_v30 }
  0x70   :  { %1302 = vrot.lane.b32.xlu1 %v1301_v10, %s1554_s17  ;;  %v155_v44 = vsel %vm149_vm0, %v140_v30, %v141_v33  ;;  %v209_v46 = vrot.slane %v1806_v29, 3  ;;  %v1316_v47 = vpack.i.bf16 %v190_v36, %v191_v32  ;;  %v142_v48 = vrot.slane %v1814_v34, 1  ;;  %639 = vmatpush1.bf16.msra.mxu0 %v1391_v39  ;;  %v1393_v10 = vld [vmem:[#allocation5 + $0x38] sm:$0xff]   ;;  %v1394_v36 = vld [vmem:[#allocation5 + $0x40] sm:$0xff]  }
  0x71   :  { %v143_v49 = vrot.slane %v1820_v38, 1  ;;  %v1321_v51 = vpack.i.bf16 %v223_v40, %v224_v41  ;;  %v1326_v53 = vpack.i.bf16 %v155_v44, %v156_v45  ;;  %v188_v54 = vsel %vm182_vm2, %v175_v37, %v176_v42  ;;  %640 = vmatprep.subr.bf16.mxu0 %v1561_v1 }
  0x72   :  { %v189_v55 = vsel %vm182_vm2, %v174_v24, %v175_v37  ;;  %v222_v56 = vsel %vm215_vm1, %v207_v25, %v208_v43  ;;  %v221_v57 = vsel %vm215_vm1, %v208_v43, %v209_v46  ;;  %v177_v58 = vrot.slane %v1814_v34, 2 }
  0x73   :  { %1307 = vrot.lane.b32.xlu0 %v1306_v31, %s1563_s18  ;;  %v178_v59 = vrot.slane %v1820_v38, 2  ;;  %v1848_v61 = vunpack.c.h.bf16 %v1191_v20  ;;  %v153_v62 = vsel %vm149_vm0, %v142_v48, %v143_v49  ;;  %v154_v63 = vsel %vm149_vm0, %v141_v33, %v142_v48 }
  0x74   :  { %1312 = vrot.lane.b32.xlu1 %v1311_v35, %s1562_s6  ;;  %v210_v0 = vrot.slane %v1814_v34, 3  ;;  %v211_v3 = vrot.slane %v1820_v38, 3  ;;  %v1331_v4 = vpack.i.bf16 %v188_v54, %v189_v55  ;;  %v1859_v5 = vunpack.c.l.bf16 %v1192_v50  ;;  %641 = vmatpush1.bf16.msra.mxu0 %v1392_v52  ;;  %v1395_v52 = vld [vmem:[#allocation5 + $0x48] sm:$0xff]  }
  0x75   :  { %vm248_vm3 = vcmp.lt.s32.totalorder %v1699_v2, 4  ;;  %v1336_v16 = vpack.i.bf16 %v221_v57, %v222_v56  ;;  %v1341_v17 = vpack.i.bf16 %v153_v62, %v154_v63  ;;  %v186_v19 = vsel %vm182_vm2, %v177_v58, %v178_v59  ;;  %642 = vmatprep.subr.bf16.mxu0 %v1561_v1 }
  0x76   :  { %v144_v20 = vrot.slane %v1848_v61, 1  ;;  %v187_v22 = vsel %vm182_vm2, %v176_v42, %v177_v58  ;;  %v219_v23 = vsel %vm215_vm1, %v210_v0, %v211_v3  ;;  %v220_v24 = vsel %vm215_vm1, %v209_v46, %v210_v0 }
  0x77   :  { %1317 = vrot.lane.b32.xlu0 %v1316_v47, %s1554_s17  ;;  %v232_v25 = vrot.slane %v1704_v6, 4  ;;  %v145_v27 = vrot.slane %v1859_v5, 1  ;;  %v233_v28 = vrot.slane %v1706_v7, 4  ;;  %v234_v30 = vrot.slane %v1708_v8, 4 }
  0x78   :  { %1322 = vrot.lane.b32.xlu1 %v1321_v51, %s1563_s18  ;;  %v235_v31 = vrot.slane %v1710_v9, 4  ;;  %v179_v32 = vrot.slane %v1848_v61, 2  ;;  %v180_v33 = vrot.slane %v1859_v5, 2  ;;  %v1881_v35 = vunpack.c.h.bf16 %v1192_v50  ;;  %643 = vmatpush1.bf16.msra.mxu0 %v1393_v10 }
  0x79   :  { %v1346_v37 = vpack.i.bf16 %v186_v19, %v187_v22  ;;  %v1351_v39 = vpack.i.bf16 %v219_v23, %v220_v24  ;;  %v152_v40 = vsel %vm149_vm0, %v143_v49, %v144_v20  ;;  %vm457_vm4 = vcmask 261120   ;;  %644 = vmatprep.subr.bf16.mxu0 %v1561_v1 }
  0x7a   :  { %v212_v41 = vrot.slane %v1848_v61, 3  ;;  %v262_v42 = vsel %vm248_vm3, %v233_v28, %v234_v30  ;;  %v263_v43 = vsel %vm248_vm3, %v232_v25, %v233_v28  ;;  %v236_v44 = vrot.slane %v1712_v11, 4 }
  0x7b   :  { %1327 = vrot.lane.b32.xlu0 %v1326_v53, %s1562_s6  ;;  %v151_v45 = vsel %vm149_vm0, %v144_v20, %v145_v27  ;;  %v213_v46 = vrot.slane %v1859_v5, 3  ;;  %v509_v47 = vpack.c.bf16 %v262_v42, %v263_v43  ;;  %v1901_v48 = vsel %vm248_vm3, %v234_v30, %v235_v31 }
  0x7c   :  { %1332 = vrot.lane.b32.xlu1 %v1331_v4, %s1554_s17  ;;  %v184_v49 = vsel %vm182_vm2, %v179_v32, %v180_v33  ;;  %v185_v50 = vsel %vm182_vm2, %v178_v59, %v179_v32  ;;  %v146_v51 = vrot.slane %v1881_v35, 1  ;;  %645 = vmatpush1.bf16.msra.mxu0 %v1394_v36  ;;  %v1912_v53 = vsel %vm248_vm3, %v235_v31, %v236_v44 }
  0x7d   :  { %646 = vmatprep.subr.bf16.mxu0 %v1561_v1  ;;  %1127 = vmatprep.mubr.msk.bf16.mxu0 %vm457_vm4, %v509_v47  ;;  %v511_v54 = vpack.c.bf16 %v1912_v53, %v1901_v48  ;;  %v1356_v55 = vpack.i.bf16 %v151_v45, %v152_v40  ;;  %v1361_v56 = vpack.i.bf16 %v184_v49, %v185_v50  ;;  %v181_v59 = vrot.slane %v1881_v35, 2 }
  0x7e   :  { %v217_v57 = vsel %vm215_vm1, %v212_v41, %v213_v46  ;;  %v218_v58 = vsel %vm215_vm1, %v211_v3, %v212_v41  ;;  %v150_v1 = vsel %vm149_vm0, %v145_v27, %v146_v51  ;;  %v165_v62 = vsel %vm149_vm0, %v146_v51, %v131_v15 }
  0x7f   :  { %1337 = vrot.lane.b32.xlu0 %v1336_v16, %s1563_s18  ;;  %v214_v63 = vrot.slane %v1881_v35, 3  ;;  %v1366_v0 = vpack.i.bf16 %v217_v57, %v218_v58  ;;  %v1371_v4 = vpack.i.bf16 %v165_v62, %v150_v1  ;;  %v183_v3 = vsel %vm182_vm2, %v180_v33, %v181_v59 }
  0x80   :  { %1342 = vrot.lane.b32.xlu1 %v1341_v17, %s1562_s6  ;;  %647 = vmatpush1.bf16.msra.mxu0 %v1395_v52  ;;  %v198_v10 = vsel %vm182_vm2, %v181_v59, %v166_v21  ;;  %v246_v21 = vrot.slane %v1859_v5, 4  ;;  %v247_v20 = vrot.slane %v1881_v35, 4  ;;  %vm474_vm5 = vcmask 523264  }
  0x81   :  { %v216_v15 = vsel %vm215_vm1, %v213_v46, %v214_v63  ;;  %v231_v16 = vsel %vm215_vm1, %v214_v63, %v199_v18  ;;  %v1376_v17 = vpack.i.bf16 %v198_v10, %v183_v3  ;;  %vm491_vm6 = vcmask 785408  }
  0x82   :  { %v1381_v19 = vpack.i.bf16 %v231_v16, %v216_v15  ;;  %v1956_v22 = vsel %vm248_vm3, %v246_v21, %v247_v20  ;;  %v1962_v18 = vsel %vm248_vm3, %v247_v20, %v232_v25  ;;  %v237_v46 = vrot.slane %v1714_v12, 4 }
  0x83   :  { %1347 = vrot.lane.b32.xlu0 %v1346_v37, %s1554_s17  ;;  %v523_v23 = vpack.c.bf16 %v1962_v18, %v1956_v22  ;;  %v238_v57 = vrot.slane %v1716_v13, 4  ;;  %v1398_v22 = vld [vmem:[#allocation8 + $0x10] sm:$0xff]   ;;  %v1399_v18 = vld [vmem:[#allocation8 + $0x18] sm:$0xff]   ;;  %vm1565_vm7 = vmmov 0   ;;  %vm876_vm10 = vcmask 1041409  }
  0x84   :  { %1352 = vrot.lane.b32.xlu1 %v1351_v39, %s1563_s18  ;;  %v259_v3 = vsel %vm248_vm3, %v236_v44, %v237_v46  ;;  %v240_v44 = vrot.slane %v1781_v60, 4  ;;  %vm879_vm11 = vcmask 1042434   ;;  %vm882_vm12 = vcmask 1043459  }
  0x85   :  { %vm885_vm13 = vcmask 1044484   ;;  %vm888_vm14 = vcmask 1045509   ;;  %vm891_vm15 = vcmask 1046534   ;;  %vm894_vm0 = vcmask 1047559  }
  0x87   :  { %1357 = vrot.lane.b32.xlu0 %v1356_v55, %s1562_s6 }
  0x88   :  { %1362 = vrot.lane.b32.xlu1 %v1361_v56, %s1554_s17 }
  0x8b   :  { %1367 = vrot.lane.b32.xlu0 %v1366_v0, %s1563_s18 }
  0x8c   :  { %1372 = vrot.lane.b32.xlu1 %v1371_v4, %s1562_s6  ;;  %v258_v4 = vsel %vm248_vm3, %v237_v46, %v238_v57 }
  0x8f   :  { %1377 = vrot.lane.b32.xlu0 %v1376_v17, %s1554_s17 }
  0x90   :  { %1382 = vrot.lane.b32.xlu1 %v1381_v19, %s1563_s18  ;;  %v513_v19 = vpack.c.bf16 %v258_v4, %v259_v3 }
  0xd5   :  { %v1268_v24 = vpop.permute.xlu0 %1267 }
  0xd6   :  { %v1278_v27 = vpop.permute.xlu1 %1277  ;;  %v1270_v28 = vunpack.i.h.bf16 %v1268_v24  ;;  %v1269_v30 = vunpack.i.l.bf16 %v1268_v24 }
  0xd7   :  { %v1280_v31 = vunpack.i.h.bf16 %v1278_v27  ;;  %v1279_v32 = vunpack.i.l.bf16 %v1278_v27  ;;  %v239_v27 = vrot.slane %v1718_v14, 4 }
  0xd8   :  { %v459_v40 = vsel %vm457_vm4, %v1706_v7, %v1270_v28  ;;  %v458_v25 = vsel %vm457_vm4, %v1704_v6, %v1269_v30 }
  0xd9   :  { %v1273_v33 = vpop.permute.xlu0 %1272 }
  0xda   :  { %v1275_v36 = vunpack.i.h.bf16 %v1273_v33  ;;  %v1274_v37 = vunpack.i.l.bf16 %v1273_v33  ;;  %v1283_v39 = vpop.permute.xlu1 %1282 }
  0xdb   :  { %v1285_v41 = vunpack.i.h.bf16 %v1283_v39  ;;  %v1284_v42 = vunpack.i.l.bf16 %v1283_v39 }
  0xdc   :  { %v475_v43 = vsel %vm474_vm5, %v458_v25, %v1274_v37  ;;  %v476_v45 = vsel %vm474_vm5, %v459_v40, %v1275_v36  ;;  %v257_v37 = vsel %vm248_vm3, %v238_v57, %v239_v27 }
  0xdd   :  { %v461_v47 = vsel %vm457_vm4, %v1710_v9, %v1285_v41  ;;  %v460_v49 = vsel %vm457_vm4, %v1708_v8, %v1284_v42  ;;  %v1288_v50 = vpop.permute.xlu0 %1287  ;;  %v492_v7 = vsel %vm491_vm6, %v475_v43, %v1279_v32  ;;  %v493_v51 = vsel %vm491_vm6, %v476_v45, %v1280_v31 }
  0xde   :  { %v1290_v6 = vunpack.i.h.bf16 %v1288_v50  ;;  %v1289_v52 = vunpack.i.l.bf16 %v1288_v50  ;;  %v1293_v55 = vpop.permute.xlu1 %1292  ;;  %v508_v56 = vpack.c.bf16 %v493_v51, %v492_v7  ;;  %v241_v50 = vrot.slane %v1800_v26, 4 }
  0xdf   :  { %v1295_v58 = vunpack.i.h.bf16 %v1293_v55  ;;  %v1294_v59 = vunpack.i.l.bf16 %v1293_v55  ;;  %v242_v7 = vrot.slane %v1806_v29, 4 }
  0xe0   :  { %v478_v1 = vsel %vm474_vm5, %v461_v47, %v1290_v6  ;;  %v477_v9 = vsel %vm474_vm5, %v460_v49, %v1289_v52  ;;  %661 = vmatmul.mubr.bf16.vlgmr.msra.gmra.mrb[0].mxu0 %v508_v56 }
  0xe1   :  { %v1298_v62 = vpop.permute.xlu0 %1297  ;;  %1128 = vmatprep.mubr.msk.bf16.mxu0 %vm457_vm4, %v511_v54  ;;  %v494_v10 = vsel %vm491_vm6, %v477_v9, %v1294_v59  ;;  %v495_v15 = vsel %vm491_vm6, %v478_v1, %v1295_v58  ;;  %v255_v58 = vsel %vm248_vm3, %v240_v44, %v241_v50 }
  0xe2   :  { %v1300_v8 = vunpack.i.h.bf16 %v1298_v62  ;;  %v1299_v63 = vunpack.i.l.bf16 %v1298_v62  ;;  %v1303_v0 = vpop.permute.xlu1 %1302  ;;  %v510_v20 = vpack.c.bf16 %v495_v15, %v494_v10  ;;  %v243_v15 = vrot.slane %v1814_v34, 4 }
  0xe3   :  { %v1305_v16 = vunpack.i.h.bf16 %v1303_v0  ;;  %v1304_v17 = vunpack.i.l.bf16 %v1303_v0 }
  0xe4   :  { %v463_v48 = vsel %vm457_vm4, %v1714_v12, %v1300_v8  ;;  %v462_v53 = vsel %vm457_vm4, %v1712_v11, %v1299_v63  ;;  %v256_v11 = vsel %vm248_vm3, %v239_v27, %v240_v44 }
  0xe5   :  { %v1308_v54 = vpop.permute.xlu0 %1307  ;;  %v479_v31 = vsel %vm474_vm5, %v462_v53, %v1304_v17  ;;  %v480_v32 = vsel %vm474_vm5, %v463_v48, %v1305_v16  ;;  %v515_v46 = vpack.c.bf16 %v256_v11, %v257_v37  ;;  %v244_v16 = vrot.slane %v1820_v38, 4 }
  0xe6   :  { %v1313_v24 = vpop.permute.xlu1 %1312  ;;  %v1310_v28 = vunpack.i.h.bf16 %v1308_v54  ;;  %v1309_v30 = vunpack.i.l.bf16 %v1308_v54  ;;  %v245_v37 = vrot.slane %v1848_v61, 4 }
  0xe7   :  { %v1315_v33 = vunpack.i.h.bf16 %v1313_v24  ;;  %v1314_v12 = vunpack.i.l.bf16 %v1313_v24  ;;  %v253_v24 = vsel %vm248_vm3, %v242_v7, %v243_v15 }
  0xe8   :  { %669 = vmatmul.mubr.bf16.gmra.mrb[4].mxu0 %v510_v20  ;;  %v496_v39 = vsel %vm491_vm6, %v479_v31, %v1309_v30  ;;  %v497_v40 = vsel %vm491_vm6, %v480_v32, %v1310_v28 }
  0xe9   :  { %v1318_v36 = vpop.permute.xlu0 %1317  ;;  %1129 = vmatprep.mubr.msk.bf16.mxu0 %vm457_vm4, %v513_v19  ;;  %v465_v43 = vsel %vm457_vm4, %v1718_v14, %v1315_v33  ;;  %v464_v45 = vsel %vm457_vm4, %v1716_v13, %v1314_v12  ;;  %v512_v47 = vpack.c.bf16 %v497_v40, %v496_v39  ;;  %v254_v13 = vsel %vm248_vm3, %v241_v50, %v242_v7 }
  0xea   :  { %v1320_v25 = vunpack.i.h.bf16 %v1318_v36  ;;  %v1319_v41 = vunpack.i.l.bf16 %v1318_v36  ;;  %v1323_v42 = vpop.permute.xlu1 %1322  ;;  %v517_v4 = vpack.c.bf16 %v254_v13, %v255_v58 }
  0xeb   :  { %v1325_v51 = vunpack.i.h.bf16 %v1323_v42  ;;  %v1324_v6 = vunpack.i.l.bf16 %v1323_v42 }
  0xec   :  { %v482_v52 = vsel %vm474_vm5, %v465_v43, %v1320_v25  ;;  %v481_v55 = vsel %vm474_vm5, %v464_v45, %v1319_v41 }
  0xed   :  { %v1328_v49 = vpop.permute.xlu0 %1327  ;;  %v498_v59 = vsel %vm491_vm6, %v481_v55, %v1324_v6  ;;  %v499_v1 = vsel %vm491_vm6, %v482_v52, %v1325_v51 }
  0xee   :  { %v1333_v56 = vpop.permute.xlu1 %1332  ;;  %v1330_v57 = vunpack.i.h.bf16 %v1328_v49  ;;  %v1329_v14 = vunpack.i.l.bf16 %v1328_v49  ;;  %v514_v3 = vpack.c.bf16 %v499_v1, %v498_v59 }
  0xef   :  { %v1335_v9 = vunpack.i.h.bf16 %v1333_v56  ;;  %v1334_v62 = vunpack.i.l.bf16 %v1333_v56 }
  0xf0   :  { %677 = vmatmul.mubr.bf16.gmra.mrb[8].mxu0 %v512_v47  ;;  %v467_v63 = vsel %vm457_vm4, %v1800_v26, %v1330_v57  ;;  %v466_v0 = vsel %vm457_vm4, %v1781_v60, %v1329_v14  ;;  %v252_v60 = vsel %vm248_vm3, %v243_v15, %v244_v16 }
  0xf1   :  { %1130 = vmatprep.mubr.msk.bf16.mxu0 %vm457_vm4, %v515_v46  ;;  %v1338_v8 = vpop.permute.xlu0 %1337  ;;  %v483_v53 = vsel %vm474_vm5, %v466_v0, %v1334_v62  ;;  %v484_v54 = vsel %vm474_vm5, %v467_v63, %v1335_v9  ;;  %v519_v12 = vpack.c.bf16 %v252_v60, %v253_v24  ;;  %v2089_v60 = vld [vmem:[#allocation7 + $0x8] sm:$0xff] }
  0xf2   :  { %v1343_v10 = vpop.permute.xlu1 %1342  ;;  %v1340_v17 = vunpack.i.h.bf16 %v1338_v8  ;;  %v1339_v48 = vunpack.i.l.bf16 %v1338_v8  ;;  %vm728_vm9 = vcmp.gt.f32.partialorder %v2089_v60, 0.5 }
  0xf3   :  { %v1345_v20 = vunpack.i.h.bf16 %v1343_v10  ;;  %v1344_v26 = vunpack.i.l.bf16 %v1343_v10 }
  0xf4   :  { %v500_v27 = vsel %vm491_vm6, %v483_v53, %v1339_v48  ;;  %v501_v44 = vsel %vm491_vm6, %v484_v54, %v1340_v17  ;;  %v1564_v48 = vmov 0.0   ;;  %v1397_v53 = vld [vmem:[#allocation8 + $0x8] sm:$0xff]  }
  0xf5   :  { %v1348_v19 = vpop.permute.xlu0 %1347  ;;  %v469_v32 = vsel %vm457_vm4, %v1814_v34, %v1345_v20  ;;  %v468_v33 = vsel %vm457_vm4, %v1806_v29, %v1344_v26  ;;  %v516_v36 = vpack.c.bf16 %v501_v44, %v500_v27  ;;  %v250_v29 = vsel %vm248_vm3, %v245_v37, %v246_v21  ;;  %1211 = vmatprep.subr.bf16.mxu1 %v1564_v48  ;;  %v1401_v54 = vld [vmem:[#allocation8 + $0x28] sm:$0xff]   ;;  %v1403_v20 = vld [vmem:[#allocation8 + $0x38] sm:$0xff]   ;;  %v2087_v26 = vld [vmem:[#allocation7] sm:$0xff] }
  0xf6   :  { %v1350_v28 = vunpack.i.h.bf16 %v1348_v19  ;;  %v1349_v30 = vunpack.i.l.bf16 %v1348_v19  ;;  %v1353_v31 = vpop.permute.xlu1 %1352  ;;  %v251_v34 = vsel %vm248_vm3, %v244_v16, %v245_v37  ;;  %v1402_v19 = vld [vmem:[#allocation8 + $0x30] sm:$0xff]   ;;  %1227 = vmatprep.mubr.msk.bf16.mxu1 %vm1565_vm7, %v1564_v48  ;;  %vm727_vm8 = vcmp.gt.f32.partialorder %v2087_v26, 0.5 }
  0xf7   :  { %v1355_v39 = vunpack.i.h.bf16 %v1353_v31  ;;  %v1354_v40 = vunpack.i.l.bf16 %v1353_v31  ;;  %v521_v52 = vpack.c.bf16 %v250_v29, %v251_v34 }
  0xf8   :  { %685 = vmatmul.mubr.bf16.gmra.mrb[12].mxu0 %v514_v3  ;;  %v486_v25 = vsel %vm474_vm5, %v469_v32, %v1350_v28  ;;  %v485_v41 = vsel %vm474_vm5, %v468_v33, %v1349_v30 }
  0xf9   :  { %1131 = vmatprep.mubr.msk.bf16.mxu0 %vm457_vm4, %v517_v4  ;;  %v1358_v11 = vpop.permute.xlu0 %1357  ;;  %v502_v46 = vsel %vm491_vm6, %v485_v41, %v1354_v40  ;;  %v503_v47 = vsel %vm491_vm6, %v486_v25, %v1355_v39 }
  0xfa   :  { %v1363_v42 = vpop.permute.xlu1 %1362  ;;  %v1360_v43 = vunpack.i.h.bf16 %v1358_v11  ;;  %v1359_v45 = vunpack.i.l.bf16 %v1358_v11  ;;  %v518_v55 = vpack.c.bf16 %v503_v47, %v502_v46 }
  0xfb   :  { %v1365_v49 = vunpack.i.h.bf16 %v1363_v42  ;;  %v1364_v50 = vunpack.i.l.bf16 %v1363_v42 }
  0xfc   :  { %v471_v51 = vsel %vm457_vm4, %v1848_v61, %v1360_v43  ;;  %v470_v6 = vsel %vm457_vm4, %v1820_v38, %v1359_v45 }
  0xfd   :  { %v1368_v7 = vpop.permute.xlu0 %1367  ;;  %v487_v2 = vsel %vm474_vm5, %v470_v6, %v1364_v50  ;;  %v488_v14 = vsel %vm474_vm5, %v471_v51, %v1365_v49  ;;  %v2104_v50 = vld [vmem:[%s2168_s3] ss:$0 sm:$0xff] }
  0xfe   :  { %v1373_v56 = vpop.permute.xlu1 %1372  ;;  %v1370_v21 = vunpack.i.h.bf16 %v1368_v7  ;;  %v1369_v57 = vunpack.i.l.bf16 %v1368_v7 }
  0xff   :  { %v1375_v13 = vunpack.i.h.bf16 %v1373_v56  ;;  %v1374_v58 = vunpack.i.l.bf16 %v1373_v56 }
 0x100   :  { %693 = vmatmul.mubr.bf16.gmra.mrb[16].mxu0 %v516_v36  ;;  %v504_v61 = vsel %vm491_vm6, %v487_v2, %v1369_v57  ;;  %v505_v1 = vsel %vm491_vm6, %v488_v14, %v1370_v21 }
 0x101   :  { %1132 = vmatprep.mubr.msk.bf16.mxu0 %vm457_vm4, %v519_v12  ;;  %v1378_v59 = vpop.permute.xlu0 %1377  ;;  %v473_v8 = vsel %vm457_vm4, %v1881_v35, %v1375_v13  ;;  %v472_v63 = vsel %vm457_vm4, %v1859_v5, %v1374_v58  ;;  %v520_v0 = vpack.c.bf16 %v505_v1, %v504_v61  ;;  %v1396_v5 = vld [vmem:[#allocation8] sm:$0xff]  }
 0x102   :  { %v1380_v38 = vunpack.i.h.bf16 %v1378_v59  ;;  %v1379_v9 = vunpack.i.l.bf16 %v1378_v59  ;;  %v1383_v62 = vpop.permute.xlu1 %1382  ;;  %1212 = vmatpush3.bf16.msra.mxu1 %v1396_v5 }
 0x103   :  { %v1385_v4 = vunpack.i.h.bf16 %v1383_v62  ;;  %v1384_v3 = vunpack.i.l.bf16 %v1383_v62  ;;  %1213 = vmatprep.subr.bf16.mxu1 %v1564_v48 }
 0x104   :  { %v490_v10 = vsel %vm474_vm5, %v473_v8, %v1380_v38  ;;  %v489_v15 = vsel %vm474_vm5, %v472_v63, %v1379_v9 }
 0x105   :  { %v506_v16 = vsel %vm491_vm6, %v489_v15, %v1384_v3  ;;  %v507_v35 = vsel %vm491_vm6, %v490_v10, %v1385_v4 }
 0x106   :  { %v522_v17 = vpack.c.bf16 %v507_v35, %v506_v16  ;;  %1214 = vmatpush3.bf16.msra.mxu1 %v1397_v53 }
 0x107   :  { %1215 = vmatprep.subr.bf16.mxu1 %v1564_v48 }
 0x108   :  { %701 = vmatmul.mubr.bf16.gmra.mrb[20].mxu0 %v518_v55 }
 0x109   :  { %1133 = vmatprep.mubr.msk.bf16.mxu0 %vm457_vm4, %v521_v52 }
 0x10a   :  { %1216 = vmatpush3.bf16.msra.mxu1 %v1398_v22 }
 0x10b   :  { %1217 = vmatprep.subr.bf16.mxu1 %v1564_v48 }
 0x10e   :  { %1218 = vmatpush3.bf16.msra.mxu1 %v1399_v18 }
 0x10f   :  { %1219 = vmatprep.subr.bf16.mxu1 %v1564_v48 }
 0x110   :  { %709 = vmatmul.mubr.bf16.gmra.mrb[24].mxu0 %v520_v0 }
 0x111   :  { %1134 = vmatprep.mubr.msk.bf16.mxu0 %vm457_vm4, %v523_v23  ;;  %v1400_v23 = vld [vmem:[#allocation8 + $0x20] sm:$0xff]  }
 0x112   :  { %1220 = vmatpush3.bf16.msra.mxu1 %v1400_v23 }
 0x113   :  { %1221 = vmatprep.subr.bf16.mxu1 %v1564_v48 }
 0x116   :  { %1222 = vmatpush3.bf16.msra.mxu1 %v1401_v54 }
 0x117   :  { %1223 = vmatprep.subr.bf16.mxu1 %v1564_v48 }
 0x118   :  { %717 = vmatmul.mubr.bf16.gmra.mrb[28].mxu0 %v522_v17 }
 0x11a   :  { %1224 = vmatpush3.bf16.msra.mxu1 %v1402_v19 }
 0x11b   :  { %1225 = vmatprep.subr.bf16.mxu1 %v1564_v48 }
 0x11e   :  { %1226 = vmatpush3.bf16.msra.mxu1 %v1403_v20 }
 0x11f   :  { %1231 = vmatprep.subr.bf16.mxu1 %v1564_v48 }
 0x1b3   :  { %v662_v24 = vpop.f32.mrb[0].mxu0 }
 0x1b4   :  { %v664_v27 = vpop.f32.mrb[1].mxu0  ;;  %v733_v28 = vsel %vm727_vm8, %v662_v24, -3e+38 }
 0x1b5   :  { %v665_v44 = vpop.f32.mrb[2].mxu0 }
 0x1b6   :  { %v734_v30 = vsel %vm728_vm9, %v665_v44, -3e+38  ;;  %v667_v31 = vpop.f32.mrb[3].mxu0 }
 0x1b7   :  { %v749_v32 = vmax.f32 %v733_v28, %v734_v30 }
 0x1b9   :  { %v750_v33 = vrot.slane %v749_v32, 4 }
 0x1bb   :  { %v751_v12 = vmax.f32 %v749_v32, %v750_v33  ;;  %v670_v36 = vpop.f32.mrb[4].mxu0 }
 0x1bc   :  { %v672_v11 = vpop.f32.mrb[5].mxu0  ;;  %v735_v40 = vsel %vm727_vm8, %v670_v36, -3e+38 }
 0x1bd   :  { %v752_v37 = vrot.slane %v751_v12, 2  ;;  %v673_v39 = vpop.f32.mrb[6].mxu0 }
 0x1be   :  { %v736_v25 = vsel %vm728_vm9, %v673_v39, -3e+38  ;;  %v675_v41 = vpop.f32.mrb[7].mxu0 }
 0x1bf   :  { %v753_v42 = vmax.f32 %v751_v12, %v752_v37  ;;  %v756_v43 = vmax.f32 %v735_v40, %v736_v25 }
 0x1c1   :  { %v754_v45 = vrot.slane %v753_v42, 1  ;;  %v757_v29 = vrot.slane %v756_v43, 4 }
 0x1c3   :  { %v758_v34 = vmax.f32 %v756_v43, %v757_v29  ;;  %v678_v46 = vpop.f32.mrb[8].mxu0  ;;  %v755_v49 = vmax.f32 %v753_v42, %v754_v45 }
 0x1c4   :  { %v680_v47 = vpop.f32.mrb[9].mxu0  ;;  %v737_v6 = vsel %vm727_vm8, %v678_v46, -3e+38 }
 0x1c5   :  { %v759_v7 = vrot.slane %v758_v34, 2  ;;  %v681_v51 = vpop.f32.mrb[10].mxu0  ;;  %v812_v57 = vadd.f32 %v2104_v50, %v755_v49 }
 0x1c6   :  { %v738_v52 = vsel %vm728_vm9, %v681_v51, -3e+38  ;;  %v683_v55 = vpop.f32.mrb[11].mxu0 }
 0x1c7   :  { %v760_v56 = vmax.f32 %v758_v34, %v759_v7  ;;  %v763_v21 = vmax.f32 %v737_v6, %v738_v52  ;;  %v820_v1 = vmax.f32 %v812_v57, 0.0 }
 0x1c9   :  { %v761_v2 = vrot.slane %v760_v56, 1  ;;  %v764_v14 = vrot.slane %v763_v21, 4  ;;  %v828_v15 = vpack.c.bf16 %v820_v1, %v820_v1 }
 0x1cb   :  { %v762_v13 = vmax.f32 %v760_v56, %v761_v2  ;;  %v765_v58 = vmax.f32 %v763_v21, %v764_v14  ;;  %v686_v59 = vpop.f32.mrb[12].mxu0  ;;  %v867_v54 = vunpack.c.l.b16 %v828_v15 }
 0x1cc   :  { %v688_v61 = vpop.f32.mrb[13].mxu0  ;;  %v739_v8 = vsel %vm727_vm8, %v686_v59, -3e+38 }
 0x1cd   :  { %v813_v38 = vadd.f32 %v2104_v50, %v762_v13  ;;  %v766_v9 = vrot.slane %v765_v58, 2  ;;  %v689_v62 = vpop.f32.mrb[14].mxu0 }
 0x1ce   :  { %v740_v63 = vsel %vm728_vm9, %v689_v62, -3e+38  ;;  %v691_v0 = vpop.f32.mrb[15].mxu0 }
 0x1cf   :  { %v821_v4 = vmax.f32 %v813_v38, 0.0  ;;  %v767_v3 = vmax.f32 %v765_v58, %v766_v9  ;;  %v770_v10 = vmax.f32 %v739_v8, %v740_v63 }
 0x1d1   :  { %v829_v16 = vpack.c.bf16 %v821_v4, %v821_v4  ;;  %v768_v35 = vrot.slane %v767_v3, 1  ;;  %v771_v17 = vrot.slane %v770_v10, 4 }
 0x1d3   :  { %v868_v5 = vunpack.c.l.b16 %v829_v16  ;;  %v769_v53 = vmax.f32 %v767_v3, %v768_v35  ;;  %v772_v22 = vmax.f32 %v770_v10, %v771_v17  ;;  %v694_v18 = vpop.f32.mrb[16].mxu0 }
 0x1d4   :  { %v696_v23 = vpop.f32.mrb[17].mxu0  ;;  %v741_v44 = vsel %vm727_vm8, %v694_v18, -3e+38 }
 0x1d5   :  { %v875_v19 = vrot.slane %v868_v5, 7  ;;  %v814_v20 = vadd.f32 %v2104_v50, %v769_v53  ;;  %v773_v24 = vrot.slane %v772_v22, 2  ;;  %v697_v27 = vpop.f32.mrb[18].mxu0 }
 0x1d6   :  { %v742_v28 = vsel %vm728_vm9, %v697_v27, -3e+38  ;;  %v699_v30 = vpop.f32.mrb[19].mxu0 }
 0x1d7   :  { %v877_v31 = vsel %vm876_vm10, %v875_v19, %v867_v54  ;;  %v822_v32 = vmax.f32 %v814_v20, 0.0  ;;  %v774_v33 = vmax.f32 %v772_v22, %v773_v24  ;;  %v777_v12 = vmax.f32 %v741_v44, %v742_v28 }
 0x1d9   :  { %v830_v36 = vpack.c.bf16 %v822_v32, %v822_v32  ;;  %v775_v11 = vrot.slane %v774_v33, 1  ;;  %v778_v37 = vrot.slane %v777_v12, 4 }
 0x1db   :  { %v869_v39 = vunpack.c.l.b16 %v830_v36  ;;  %v776_v40 = vmax.f32 %v774_v33, %v775_v11  ;;  %v779_v25 = vmax.f32 %v777_v12, %v778_v37  ;;  %v702_v41 = vpop.f32.mrb[20].mxu0 }
 0x1dc   :  { %v704_v42 = vpop.f32.mrb[21].mxu0  ;;  %v743_v46 = vsel %vm727_vm8, %v702_v41, -3e+38 }
 0x1dd   :  { %v878_v43 = vrot.slane %v869_v39, 6  ;;  %v815_v45 = vadd.f32 %v2104_v50, %v776_v40  ;;  %v780_v29 = vrot.slane %v779_v25, 2  ;;  %v705_v34 = vpop.f32.mrb[22].mxu0 }
 0x1de   :  { %v744_v47 = vsel %vm728_vm9, %v705_v34, -3e+38  ;;  %v707_v49 = vpop.f32.mrb[23].mxu0 }
 0x1df   :  { %v823_v7 = vmax.f32 %v815_v45, 0.0  ;;  %v781_v51 = vmax.f32 %v779_v25, %v780_v29  ;;  %v784_v6 = vmax.f32 %v743_v46, %v744_v47  ;;  %v880_v52 = vsel %vm879_vm11, %v878_v43, %v877_v31 }
 0x1e1   :  { %v831_v55 = vpack.c.bf16 %v823_v7, %v823_v7  ;;  %v782_v56 = vrot.slane %v781_v51, 1  ;;  %v785_v21 = vrot.slane %v784_v6, 4 }
 0x1e3   :  { %v870_v57 = vunpack.c.l.b16 %v831_v55  ;;  %v783_v2 = vmax.f32 %v781_v51, %v782_v56  ;;  %v786_v14 = vmax.f32 %v784_v6, %v785_v21  ;;  %v710_v13 = vpop.f32.mrb[24].mxu0  ;;  %v1404_v55 = vld [vmem:[#allocation10] sm:$0xff]   ;;  %v1405_v21 = vld [vmem:[#allocation10 + $0x8] sm:$0xff]  }
 0x1e4   :  { %v712_v58 = vpop.f32.mrb[25].mxu0  ;;  %v745_v9 = vsel %vm727_vm8, %v710_v13, -3e+38  ;;  %v1410_v13 = vld [vmem:[#allocation10 + $0x30] sm:$0xff]  }
 0x1e5   :  { %v881_v59 = vrot.slane %v870_v57, 5  ;;  %v816_v61 = vadd.f32 %v2104_v50, %v783_v2  ;;  %v787_v1 = vrot.slane %v786_v14, 2  ;;  %v713_v38 = vpop.f32.mrb[26].mxu0  ;;  %v1407_v57 = vld [vmem:[#allocation10 + $0x18] sm:$0xff]   ;;  %v1408_v2 = vld [vmem:[#allocation10 + $0x20] sm:$0xff]  }
 0x1e6   :  { %v746_v62 = vsel %vm728_vm9, %v713_v38, -3e+38  ;;  %v715_v8 = vpop.f32.mrb[27].mxu0  ;;  %v1411_v58 = vld [vmem:[#allocation10 + $0x38] sm:$0xff]  }
 0x1e7   :  { %v824_v63 = vmax.f32 %v816_v61, 0.0  ;;  %v788_v0 = vmax.f32 %v786_v14, %v787_v1  ;;  %v791_v4 = vmax.f32 %v745_v9, %v746_v62  ;;  %v883_v3 = vsel %vm882_vm12, %v881_v59, %v880_v52  ;;  %v1409_v14 = vld [vmem:[#allocation10 + $0x28] sm:$0xff]   ;;  %v1136_v59 = vld [vmem:[%s2170_s5] ss:$0 sm:$0xff]  ;;  %s1522_s5 = scalar_lea.vmem %s1107_s29, 128 }
 0x1e8   :  { %p1523_p12 = scmp.ne.s32.totalorder %s1107_s29, %s1522_s5  ;;  %p1528_p0 = scmp.lt.s32.totalorder %s1522_s5, %s1522_s5 }
 0x1e9   :  { %v832_v10 = vpack.c.bf16 %v824_v63, %v824_v63  ;;  %v789_v15 = vrot.slane %v788_v0, 1  ;;  %v792_v16 = vrot.slane %v791_v4, 4 }
 0x1ea   :  { %p1529_p1 = por %p1528_p0, %p1527_p13 }
 0x1eb   :  { %v871_v35 = vunpack.c.l.b16 %v832_v10  ;;  %v790_v17 = vmax.f32 %v788_v0, %v789_v15  ;;  %v793_v5 = vmax.f32 %v791_v4, %v792_v16  ;;  %v718_v53 = vpop.f32.mrb[28].mxu0  ;;  %v1145_v0 = vld [vmem:[%s2172_s7] ss:$0 sm:$0xff] }
 0x1ec   :  { %v720_v22 = vpop.f32.mrb[29].mxu0  ;;  %v747_v20 = vsel %vm727_vm8, %v718_v53, -3e+38  ;;  %p1530_p2 = pnand %p1529_p1, %p1523_p12 }
 0x1ed   :  { %v884_v18 = vrot.slane %v871_v35, 4  ;;  %v817_v23 = vadd.f32 %v2104_v50, %v790_v17  ;;  %v794_v54 = vrot.slane %v793_v5, 2  ;;  %v721_v19 = vpop.f32.mrb[30].mxu0 }
 0x1ee   :  { %v748_v24 = vsel %vm728_vm9, %v721_v19, -3e+38  ;;  %v723_v27 = vpop.f32.mrb[31].mxu0 }
 0x1ef   :  { %v825_v44 = vmax.f32 %v817_v23, 0.0  ;;  %v795_v28 = vmax.f32 %v793_v5, %v794_v54  ;;  %v798_v30 = vmax.f32 %v747_v20, %v748_v24  ;;  %v886_v31 = vsel %vm885_vm13, %v884_v18, %v883_v3 }
 0x1f1   :  { %v833_v32 = vpack.c.bf16 %v825_v44, %v825_v44  ;;  %v796_v33 = vrot.slane %v795_v28, 1  ;;  %v799_v12 = vrot.slane %v798_v30, 4 }
 0x1f3   :  { %v872_v36 = vunpack.c.l.b16 %v833_v32  ;;  %v797_v11 = vmax.f32 %v795_v28, %v796_v33  ;;  %v800_v37 = vmax.f32 %v798_v30, %v799_v12 }
 0x1f5   :  { %v887_v39 = vrot.slane %v872_v36, 3  ;;  %v818_v40 = vadd.f32 %v2104_v50, %v797_v11  ;;  %v801_v26 = vrot.slane %v800_v37, 2 }
 0x1f7   :  { %v826_v25 = vmax.f32 %v818_v40, 0.0  ;;  %v802_v41 = vmax.f32 %v800_v37, %v801_v26  ;;  %v889_v60 = vsel %vm888_vm14, %v887_v39, %v886_v31 }
 0x1f9   :  { %v834_v42 = vpack.c.bf16 %v826_v25, %v826_v25  ;;  %v803_v43 = vrot.slane %v802_v41, 1 }
 0x1fb   :  { %v873_v45 = vunpack.c.l.b16 %v834_v42  ;;  %v804_v29 = vmax.f32 %v802_v41, %v803_v43 }
 0x1fd   :  { %v819_v34 = vadd.f32 %v2104_v50, %v804_v29  ;;  %v890_v46 = vrot.slane %v873_v45, 2  ;;  %v1406_v50 = vld [vmem:[#allocation10 + $0x10] sm:$0xff]  }
 0x1ff   :  { %v827_v47 = vmax.f32 %v819_v34, 0.0  ;;  %v892_v49 = vsel %vm891_vm15, %v890_v46, %v889_v60 }
 0x201   :  { %v835_v7 = vpack.c.bf16 %v827_v47, %v827_v47 }
 0x203   :  { %v874_v51 = vunpack.c.l.b16 %v835_v7 }
 0x205   :  { %v893_v6 = vrot.slane %v874_v51, 1 }
 0x207   :  { %v895_v52 = vsel %vm894_vm0, %v893_v6, %v892_v49 }
 0x208   :  { %v896_v56 = vpack.c.b16 %v895_v52, %v895_v52 }
 0x20a   :  { %1228 = vmatmul.mubr.bf16.vlgmr.msra.gmra.mrb[0].mxu1 %v896_v56 }
 0x20b   :  { %1232 = vmatpush3.bf16.msra.mxu1 %v1404_v55  ;;  %1247 = vmatprep.mubr.msk.bf16.mxu1 %vm1565_vm7, %v1564_v48 }
 0x20c   :  { %1233 = vmatprep.subr.bf16.mxu1 %v1564_v48 }
 0x20f   :  { %1234 = vmatpush3.bf16.msra.mxu1 %v1405_v21 }
 0x210   :  { %1235 = vmatprep.subr.bf16.mxu1 %v1564_v48 }
 0x213   :  { %1236 = vmatpush3.bf16.msra.mxu1 %v1406_v50 }
 0x214   :  { %1237 = vmatprep.subr.bf16.mxu1 %v1564_v48 }
 0x217   :  { %1238 = vmatpush3.bf16.msra.mxu1 %v1407_v57 }
 0x218   :  { %1239 = vmatprep.subr.bf16.mxu1 %v1564_v48 }
 0x21b   :  { %1240 = vmatpush3.bf16.msra.mxu1 %v1408_v2 }
 0x21c   :  { %1241 = vmatprep.subr.bf16.mxu1 %v1564_v48 }
 0x21f   :  { %1242 = vmatpush3.bf16.msra.mxu1 %v1409_v14 }
 0x220   :  { %1243 = vmatprep.subr.bf16.mxu1 %v1564_v48 }
 0x223   :  { %1244 = vmatpush3.bf16.msra.mxu1 %v1410_v13 }
 0x224   :  { %1245 = vmatprep.subr.bf16.mxu1 %v1564_v48 }
 0x227   :  { %1246 = vmatpush3.bf16.msra.mxu1 %v1411_v58 }
 0x2dd   :  { %v980_v61 = vpop.f32.mrb[0].mxu1 }
 0x2de   :  { %v981_v1 = vadd.f32 %v1136_v59, %v980_v61  ;;  %v1229_v38 = vpop.f32.mrb[1].mxu1 }
 0x2df   :  { %v983_v9 = vpop.f32.mrb[2].mxu1 }
 0x2e0   :  { %v986_v62 = vmax.f32 %v981_v1, 0.0  ;;  %v1230_v8 = vpop.f32.mrb[3].mxu1 }
 0x2e2   :  { %v987_v63 = vpack.c.bf16 %v986_v62, %v986_v62 }
 0x2e4   :  { %1248 = vmatmul.mubr.bf16.vlgmr.msra.gmra.mrb[4].mxu1 %v987_v63 }
 0x3b7   :  { %v1093_v48 = vpop.f32.mrb[4].mxu1 }
 0x3b8   :  { %v1094_v4 = vadd.f32 %v1145_v0, %v1093_v48  ;;  %v1249_v3 = vpop.f32.mrb[5].mxu1 }
 0x3b9   :  { %v1096_v10 = vpop.f32.mrb[6].mxu1 }
 0x3ba   :  { %1099 = vst [vmem:[#allocation11] sm:$0xff] %v1094_v4  ;;  %v1250_v15 = vpop.f32.mrb[7].mxu1 }
 0x3bb   :  { %1533 = shalt.err (!%p1530_p2)
}
 0x3bc   :  { %s1534_s7 = scalar_lea.hbm %s2173_s8, 128 }
 0x3bd   :  { %p1535_p3 = scmp.ne.s32.totalorder %s2173_s8, %s1534_s7  ;;  %p1538_p4 = scmp.lt.u32.totalorder %s1534_s7, %s2173_s8 }
 0x3bf   :  { %p1540_p5 = pnand %p1538_p4, %p1535_p3 }
 0x3c1   :  { %1543 = shalt.err (!%p1540_p5)
}
 0x3c2   :  { %1109 = dma.vmem_to_hbm [thread:$0]  %s1107_s29, 128, %s2173_s8, [#allocation4]  }
 0x3c3   :  { %1550 = dma.done.wait [#allocation4], 128  }
 0x3c4   :  { %1551 = vsyncadd [#allocation4], 4294967168 }
 0x3c5   :  { %1113 = vsyncpa [#allocation3], 1 }
 0x3c6   :  { %1114 = vsyncpa [#allocation6], 1 }
 0x3c7   :  { %1115 = vsyncpa [#allocation9], 1 }
 0x3c8   :  { %1116 = vsyncpa [#allocation4], 1 }

</bundles_post_ra>
